<compile_context>
chip_gen: v7x
topology: tpu7x:2x2x1
jax: 0.10.0
libtpu: 0.0.40
codegen_flags: <defaults>
</compile_context>

<pallas_src>
import jax
import jax.numpy as jnp
from jax.experimental import pallas as pl
from jax.experimental.pallas import tpu as pltpu


def _baseline_kernel(emb_ref, w_ref, b_ref, o_ref, acc_ref):
    # emb_ref: [s_tile, b_tile, D]  (VMEM, f32 or bf16)
    # w_ref:   [1, D]               (VMEM, f32, already scaled by 1/S)
    # b_ref:   [1]                  (SMEM, f32 scalar bias)
    # o_ref:   [1, b_tile]          (VMEM, f32, lane-dense output)
    # acc_ref: [b_tile, D]          (VMEM scratch, f32 running sum over S)
    s = pl.program_id(1)

    @pl.when(s == 0)
    def _init():
        acc_ref[...] = jnp.zeros_like(acc_ref)

    # Partial sum over this sequence tile.  Upcast keeps bf16 inputs accurate
    # (no-op for f32 inputs); accumulation is always f32.
    acc_ref[...] += jnp.sum(emb_ref[...].astype(jnp.float32), axis=0)

    @pl.when(s == pl.num_programs(1) - 1)
    def _finalize():
        # fc(avg): VPU multiply + lane reduce; the 1/S of the mean is already
        # folded into w, so this is sum-over-D of acc * w, plus the bias.
        out = jnp.sum(acc_ref[...] * w_ref[...], axis=-1)   # [b_tile]
        out = out + b_ref[0]                                 # SMEM scalar bias
        o_ref[...] = out[None, :].astype(o_ref.dtype)        # [1, b_tile]


def baseline_forward(x_ids, emb_table, fc_w, fc_b, *,
                     s_tile=None, b_tile=None, compute_dtype=jnp.float32):
    """x_ids: [S, B] int32, emb_table: [V, D], fc_w: [1, D], fc_b: [1]."""
    S, B = x_ids.shape
    D = emb_table.shape[1]

    # Tile choices.  For real workloads use a few hundred sequence rows per
    # tile (e.g. 256-512) and a batch tile that's a multiple of 128 for large
    # B; keep 2 * (s_tile * b_tile * D * bytes) well under the scoped VMEM
    # limit (v7x has only 64 MiB physical VMEM).
    if s_tile is None:
        s_tile = 8 if S % 8 == 0 else S
    if b_tile is None:
        b_tile = B
    assert S % s_tile == 0 and B % b_tile == 0

    # Embedding lookup stays as an XLA gather in the wrapper (see TODO above).
    # Optionally feed it at reduced precision to halve HBM traffic; the kernel
    # accumulates in f32 regardless.
    embedded = emb_table.astype(compute_dtype)[x_ids]        # [S, B, D]

    # Lane-dense [1, D] weight row with the 1/S of the mean folded in.
    w_scaled = (fc_w.astype(jnp.float32) * jnp.float32(1.0 / S)).reshape(1, D)
    bias = fc_b.astype(jnp.float32).reshape(1)

    grid = (B // b_tile, S // s_tile)   # (parallel batch axis, seq reduction)

    out = pl.pallas_call(
        _baseline_kernel,
        out_shape=jax.ShapeDtypeStruct((1, B), jnp.float32),
        grid_spec=pltpu.PrefetchScalarGridSpec(
            num_scalar_prefetch=0,
            grid=grid,
            in_specs=[
                pl.BlockSpec((s_tile, b_tile, D), lambda b, s: (s, b, 0)),
                pl.BlockSpec((1, D), lambda b, s: (0, 0)),
                pl.BlockSpec(memory_space=pltpu.MemorySpace.SMEM),
            ],
            out_specs=pl.BlockSpec((1, b_tile), lambda b, s: (0, b)),
            scratch_shapes=[pltpu.VMEM((b_tile, D), jnp.float32)],
        ),
        compiler_params=pltpu.CompilerParams(
            dimension_semantics=("parallel", "arbitrary")),
    )(embedded, w_scaled, bias)

    return out[0]                                            # squeeze -> [B]


if __name__ == "__main__":
    key = jax.random.PRNGKey(0)
    k_vocab, k_w, k_b, k_ids = jax.random.split(key, 4)

    vocab_size = 20
    embedding_dim = 32
    seq_len = 16
    batch = 8

    # Deterministic "pretrained" embedding table + fc params.
    emb_table = jax.random.normal(k_vocab, (vocab_size, embedding_dim),
                                  dtype=jnp.float32)
    fc_w = jax.random.normal(k_w, (1, embedding_dim), dtype=jnp.float32) * 0.1
    fc_b = jax.random.normal(k_b, (1,), dtype=jnp.float32) * 0.1

    # Token ids: [seq_len, batch] (torchtext convention, matching .mean(0)).
    x_ids = jax.random.randint(k_ids, (seq_len, batch), 0, vocab_size,
                               dtype=jnp.int32)

    # f32 path (exercises 2 reduction steps over the sequence grid axis).
    out = baseline_forward(x_ids, emb_table, fc_w, fc_b)
    out = jax.block_until_ready(out)

    # Reference check in plain JAX.
    ref = (emb_table[x_ids].mean(0) @ fc_w.T + fc_b)[:, 0]
    assert out.shape == (batch,)
    assert jnp.allclose(out, ref, atol=1e-5, rtol=1e-5)

    # bf16-input path (half HBM traffic for the embedded tensor, f32 accum).
    out_bf16 = baseline_forward(x_ids, emb_table, fc_w, fc_b,
                                compute_dtype=jnp.bfloat16)
    out_bf16 = jax.block_until_ready(out_bf16)
    assert jnp.allclose(out_bf16, ref, atol=2e-2)

    print("KERNEL_OK")
</pallas_src>

<mosaic_0001>
module attributes {stable_mosaic.version = 11 : i64} {
  func.func @_baseline_kernel(%arg0: i32, %arg1: i32, %arg2: memref<8x8x32xf32, #tpu.memory_space<vmem>>, %arg3: memref<1x32xf32, #tpu.memory_space<vmem>>, %arg4: memref<1xf32, #tpu.memory_space<smem>>, %arg5: memref<1x8xf32, #tpu.memory_space<vmem>>, %arg6: memref<8x32xf32, #tpu.memory_space<vmem>>) attributes {dimension_semantics = [#tpu.dimension_semantics<parallel>, #tpu.dimension_semantics<arbitrary>], iteration_bounds = array<i64: 1, 2>, scalar_prefetch = 0 : i64, scratch_operands = 1 : i64, tpu.core_type = #tpu.core_type<tc>, window_params = [{transform_indices = @transform_0, window_bounds = array<i64: 8, 8, 32>}, {pipeline_mode = #tpu.pipeline_mode<synchronous>, transform_indices = @transform_1, window_bounds = array<i64: 1, 32>}, {transform_indices = @transform_2, window_bounds = array<i64: 1>}, {transform_indices = @transform_3, window_bounds = array<i64: 1, 8>}]} {
    %c0_i32 = arith.constant 0 : i32
    %0 = arith.cmpi eq, %arg1, %c0_i32 : i32
    %1 = arith.extui %0 : i1 to i32
    %c0_i32_0 = arith.constant 0 : i32
    %2 = arith.cmpi ne, %1, %c0_i32_0 : i32
    scf.if %2 {
      %cst_8 = arith.constant 0.000000e+00 : f32
      %11 = vector.broadcast %cst_8 : f32 to vector<8x32xf32>
      %c0_9 = arith.constant 0 : index
      %c0_10 = arith.constant 0 : index
      %12 = vector.load %arg6[%c0_9, %c0_10] : memref<8x32xf32, #tpu.memory_space<vmem>>, vector<8x32xf32>
      tpu.vector_store %arg6[%c0_9, %c0_10], %11 {strides = array<i32>} : memref<8x32xf32, #tpu.memory_space<vmem>>, vector<8x32xf32>,
    } else {
    }
    %c0 = arith.constant 0 : index
    %c0_1 = arith.constant 0 : index
    %3 = vector.load %arg6[%c0, %c0_1] : memref<8x32xf32, #tpu.memory_space<vmem>>, vector<8x32xf32>
    %c0_2 = arith.constant 0 : index
    %c0_3 = arith.constant 0 : index
    %c0_4 = arith.constant 0 : index
    %4 = vector.load %arg2[%c0_2, %c0_3, %c0_4] : memref<8x8x32xf32, #tpu.memory_space<vmem>>, vector<8x8x32xf32>
    %cst = arith.constant dense<0.000000e+00> : vector<8x32xf32>
    %5 = vector.multi_reduction <add>, %4, %cst [0] : vector<8x8x32xf32> to vector<8x32xf32>
    %6 = arith.addf %3, %5 : vector<8x32xf32>
    %c0_5 = arith.constant 0 : index
    %c0_6 = arith.constant 0 : index
    %7 = vector.load %arg6[%c0_5, %c0_6] : memref<8x32xf32, #tpu.memory_space<vmem>>, vector<8x32xf32>
    tpu.vector_store %arg6[%c0_5, %c0_6], %6 {strides = array<i32>} : memref<8x32xf32, #tpu.memory_space<vmem>>, vector<8x32xf32>,
    %c1_i32 = arith.constant 1 : i32
    %8 = arith.cmpi eq, %arg1, %c1_i32 : i32
    %9 = arith.extui %8 : i1 to i32
    %c0_i32_7 = arith.constant 0 : i32
    %10 = arith.cmpi ne, %9, %c0_i32_7 : i32
    scf.if %10 {
      %c0_8 = arith.constant 0 : index
      %c0_9 = arith.constant 0 : index
      %11 = vector.load %arg6[%c0_8, %c0_9] : memref<8x32xf32, #tpu.memory_space<vmem>>, vector<8x32xf32>
      %c0_10 = arith.constant 0 : index
      %c0_11 = arith.constant 0 : index
      %12 = vector.load %arg3[%c0_10, %c0_11] : memref<1x32xf32, #tpu.memory_space<vmem>>, vector<1x32xf32>
      %13 = vector.broadcast %12 : vector<1x32xf32> to vector<8x32xf32>
      %14 = arith.mulf %11, %13 : vector<8x32xf32>
      %cst_12 = arith.constant dense<0.000000e+00> : vector<8xf32>
      %15 = vector.multi_reduction <add>, %14, %cst_12 [1] : vector<8x32xf32> to vector<8xf32>
      %c0_13 = arith.constant 0 : index
      %16 = memref.load %arg4[%c0_13] : memref<1xf32, #tpu.memory_space<smem>>
      %17 = vector.broadcast %16 : f32 to vector<8xf32>
      %18 = arith.addf %15, %17 : vector<8xf32>
      %19 = vector.shape_cast %18 : vector<8xf32> to vector<1x8xf32>
      %c0_14 = arith.constant 0 : index
      %c0_15 = arith.constant 0 : index
      %20 = vector.load %arg5[%c0_14, %c0_15] : memref<1x8xf32, #tpu.memory_space<vmem>>, vector<1x8xf32>
      tpu.vector_store %arg5[%c0_14, %c0_15], %19 {strides = array<i32>} : memref<1x8xf32, #tpu.memory_space<vmem>>, vector<1x8xf32>,
    } else {
    }
    return
  }
  func.func @transform_0(%arg0: i32, %arg1: i32) -> (i32, i32, i32) {
    %c0_i32 = arith.constant 0 : i32
    %c0_i32_0 = arith.constant 0 : i32
    return %arg1, %arg0, %c0_i32 : i32, i32, i32
  }
  func.func @transform_1(%arg0: i32, %arg1: i32) -> (i32, i32) {
    %c0_i32 = arith.constant 0 : i32
    %c0_i32_0 = arith.constant 0 : i32
    %c0_i32_1 = arith.constant 0 : i32
    return %c0_i32, %c0_i32_0 : i32, i32
  }
  func.func @transform_2(%arg0: i32, %arg1: i32) -> i32 {
    %c0_i32 = arith.constant 0 : i32
    %c0_i32_0 = arith.constant 0 : i32
    return %c0_i32 : i32
  }
  func.func @transform_3(%arg0: i32, %arg1: i32) -> (i32, i32) {
    %c0_i32 = arith.constant 0 : i32
    %c0_i32_0 = arith.constant 0 : i32
    return %c0_i32, %arg0 : i32, i32
  }
}

</mosaic_0001>

<bundles_post_ra>
// kernel: tpu_custom_call.1
= control target key start
LH: loop header
LB: loop body
LE: loop exit
PB: predicated region body
PF: predicated region fallthrough
CT: control target
= control target key end

     0   :  { %s718_s0 = inlined_call_operand.hbm [shape: f32[16,8,32], index: 0, kind: input, shape index: {}]   ;;  %s719_s1 = inlined_call_operand.vmem [shape: f32[1,32], index: 1, kind: input, shape index: {}]   ;;  %s720_s2 = inlined_call_operand.<no memory space> [shape: f32[1], index: 2, kind: input, shape index: {}]   ;;  %s721_s3 = inlined_call_operand.hbm [shape: f32[1,8], index: 3, kind: output, shape index: {}]  }
   0x1   :  { %8 = sst [smem:[#allocation3]] %s720_s2 }
   0x2   :  { %9 = vsyncpa [#allocation5], 0 }
   0x3   :  { %11 = vsyncpa [#allocation5 + $0x1], 0 }
   0x4   :  { %12 = vsyncpa [#allocation6], 0  ;;  %s554_s14 = smov 0   ;;  %s556_s15 = smov 0  }
   0x5   :  { %s558_s16 = smov 0   ;;  %s560_s17 = smov 0  }
   0x6   :  { %s562_s18 = smov 0   ;;  %s564_s19 = smov 0  }
   0x7 LB: > { %s333_s2 = sadd.s32 4294967295, %s524_s19   ;;  %s27_s20 = sadd.s32 1, %s520_s18  ;;  %s524_s19 = sphi %s564_s19, %s18_s19   ;;  %s520_s18 = sphi %s562_s18, %s730_s18   ;;  %s516_s17 = sphi %s560_s17, %s729_s17   ;;  %s512_s16 = sphi %s558_s16, %s728_s16   ;;  %s508_s15 = sphi %s556_s15, %s727_s15   ;;  %s504_s14 = sphi %s554_s14, %s726_s14  }
   0x8   : > { %p28_p0 = scmp.ge.s32.totalorder %s27_s20, 2  ;;  %s39_s21 = sadd.s32 1, %s512_s16 }
   0x9   : > { %p46_p1 = scmp.ne.s32.totalorder %s512_s16, %s508_s15  ;;  %p47_p2 = scmp.eq.s32.totalorder %s524_s19, 0 }
   0xa   : > { %s732_s20 = smov (%p28_p0, %s27_s20), 0  ;;  %p52_p4 = scmp.ne.s32.totalorder %s508_s15, %s504_s14 }
   0xb   : > { %p590_p3 = por %p47_p2, %p46_p1  ;;  %s34_s23 = ssub.s32 %s520_s18, %s732_s20 }
   0xc   : > { %p53_p5 = scmp.eq.s32.totalorder %s333_s2, 0  ;;  %p37_p6 = scmp.eq.s32.totalorder %s34_s23, 0 }
   0xd   : > { %p359_p8 = scmp.lt.s32.totalorder %s524_s19, 2  ;;  %s150_s26 = sand.u32 1, %s512_s16  }
   0xe   : > { %p599_p7 = por %p53_p5, %p52_p4  ;;  %s348_s27 = sshll.u32 %s520_s18, 10 }
   0xf   : > { %s605_s25 = scalar_select %p37_p6, %s512_s16, %s39_s21  }
  0x10   : > { %s336_s28 = sshll.u32 %s150_s26, 6  ;;  %s612_s4 = scalar_lea.hbm %s718_s0, %s348_s27 }
  0x11   : > { %s154_s5 = scalar_lea.vmem [#allocation4], %s336_s28  ;;  %p616_p9 = pnand %p359_p8, %p590_p3 }
  0x12   : > { %s162_s6 = sshll.u32 %s154_s5, 4  ;;  %s622_s8 = scalar_lea.sflag [#allocation5], %s150_s26  ;;  %s620_s6 = int_to_ptr.vmem [resolvable:$true] %s162_s6 }
  0x13   : > { %s414_s9 = scalar_lea.hbm %s612_s4, 1024  ;;  %p416_p11 = pneg %p616_p9 }
  0x14   : > { %p415_p10 = scmp.ne.s32.totalorder %s612_s4, %s414_s9  ;;  %s419_s12 = scalar_lea.hbm %s718_s0, 2048 }
  0x15   : > { %p420_p0 = scmp.lt.u32.totalorder %s612_s4, %s718_s0  ;;  %p421_p1 = scmp.lt.u32.totalorder %s419_s12, %s414_s9 }
  0x16   : > { %p417_p12 = pnand %p416_p11, %p415_p10  ;;  %p423_p3 = scmp.lt.u32.totalorder %s414_s9, %s612_s4 }
  0x17   : > { %p422_p2 = por %p421_p1, %p420_p0 }
  0x18   : > { %p418_p13 = pneg %p417_p12 }
  0x19   : > { %p424_p4 = por %p423_p3, %p422_p2 }
  0x1b   : > { %p425_p5 = pnand %p424_p4, %p418_p13 }
  0x1d   : > { %428 = shalt.err (!%p425_p5)
}
  0x1e   : > { %s429_s21 = scalar_lea.vmem %s620_s6, 1024  ;;  %s526_s22 = smov [#allocation4]  }
  0x1f   : > { %p430_p6 = scmp.ne.s32.totalorder %s620_s6, %s429_s21  ;;  %s434_s23 = sshll.u32 %s526_s22, 4  ;;  %s435_s23 = int_to_ptr.vmem [resolvable:$false] %s434_s23 }
  0x20   : > { %s436_s26 = scalar_lea.vmem %s435_s23, 2048  ;;  %p437_p12 = scmp.lt.s32.totalorder %s620_s6, %s435_s23 }
  0x21   : > { %p432_p8 = pnand %p430_p6, %p416_p11  ;;  %p438_p0 = scmp.lt.s32.totalorder %s436_s26, %s429_s21 }
  0x23   : > { %p433_p10 = pneg %p432_p8  ;;  %p439_p1 = por %p438_p0, %p437_p12 }
  0x25   : > { %p440_p2 = pnand %p439_p1, %p433_p10 }
  0x27   : > { %443 = shalt.err (!%p440_p2)
}
  0x28   : > { %s527_s27 = smov 128   ;;  %s528_s28 = smov 8  }
  0x29   : > { %358 = dma.hbm_to_vmem [thread:$0]  (!%p616_p9), %s612_s4, 1024, %s620_s6, %s622_s8, %s527_s27, %s527_s27, %s528_s28  }
  0x2a   : > { %p339_p11 = scmp.ge.s32.totalorder %s524_s19, 1  ;;  %p170_p13 = scmp.lt.s32.totalorder %s524_s19, 3 }
  0x2c   : > { %p171_p3 = pnand %p339_p11, %p170_p13 }
  0x2d   : > { %s176_s29 = sand.u32 (!%p171_p3), 1, %s508_s15  }
  0x2e   : > { %174 = sbr.rel (%p171_p3) target bundleno = 264 (0x108), region = 32  ;;  %s340_s30 = sshll.u32 (!%p171_p3), %s176_s29, 6 }
  0x2f   : > { %s177_s5 = scalar_lea.sflag (!%p171_p3), [#allocation5], %s176_s29  ;;  %s180_s9 = scalar_lea.vmem (!%p171_p3), [#allocation4], %s340_s30 }
  0x35   : > { %495 = dma.done.wait (%p599_p7), %s177_s5, 1024  }
  0x36   : > { %497 = vsyncadd (%p599_p7), %s177_s5, 4294966272  ;;  %p341_p4 = scmp.ne.s32.totalorder %s516_s17, 0 }
  0x37   : > { %vm203_vm0 = vcmask (!%p341_p4), 261120   ;;  %v529_v0 = vmov (!%p341_p4), 0.0  }
  0x38   : > { %202 = sbr.rel (%p341_p4) target bundleno = 63 (0x3f), region = 40  ;;  %204 = vst.msk [vmem:[#allocation2] sm:$0xff] (!%p341_p4), %vm203_vm0, %v529_v0 }
  0x3f PF: > { %v206_v1 = vld [vmem:[%s180_s9] sm:$0xff]  ;;  %v207_v2 = vld [vmem:[%s180_s9 + $0x8] sm:$0xff]  ;;  %vm214_vm1 = vcmask 261120   ;;  %v208_v3 = vld [vmem:[%s180_s9 + $0x10] sm:$0xff]  ;;  %p342_p7 = scmp.ne.s32.totalorder %s516_s17, 1 }
  0x40   : > { %v209_v4 = vld [vmem:[%s180_s9 + $0x18] sm:$0xff]  ;;  %v215_v5 = vsel %vm214_vm1, %v206_v1, 0.0  ;;  %v216_v6 = vsel %vm214_vm1, %v207_v2, 0.0  ;;  %v210_v7 = vld [vmem:[%s180_s9 + $0x20] sm:$0xff]  ;;  %v218_v9 = vsel %vm214_vm1, %v208_v3, 0.0  ;;  %v211_v11 = vld [vmem:[%s180_s9 + $0x28] sm:$0xff]  ;;  %v252_v30 = vlaneseq (!%p342_p7) }
  0x41   : > { %v217_v8 = vadd.f32 %v216_v6, %v215_v5  ;;  %v220_v10 = vsel %vm214_vm1, %v209_v4, 0.0  ;;  %v222_v13 = vsel %vm214_vm1, %v210_v7, 0.0  ;;  %v212_v14 = vld [vmem:[%s180_s9 + $0x30] sm:$0xff]  ;;  %v224_v16 = vsel %vm214_vm1, %v211_v11, 0.0  ;;  %v213_v17 = vld [vmem:[%s180_s9 + $0x38] sm:$0xff]  ;;  %s248_s6 = sld [smem:[#allocation3]] (!%p342_p7) }
  0x42   : > { %v226_v19 = vsel %vm214_vm1, %v212_v14, 0.0  ;;  %v228_v21 = vsel %vm214_vm1, %v213_v17, 0.0  ;;  %v205_v23 = vld [vmem:[#allocation2] sm:$0xff]  ;;  %v253_v31 = vand.u32 (!%p342_p7), 127, %v252_v30  ;;  %v255_v32 = vshrl.u32 (!%p342_p7), %v252_v30, 7 }
  0x43   : > { %v219_v12 = vadd.f32 %v218_v9, %v217_v8  ;;  %v343_v27 = vld [vmem:[%s719_s1] ss:$0 sm:$0xff] (!%p342_p7)  ;;  %vm259_vm2 = vcmask (!%p342_p7), 57344  }
  0x44   : > { %v256_v34 = vsub.s32 (!%p342_p7), %v253_v31, %v255_v32 }
  0x45   : > { %v221_v15 = vadd.f32 %v220_v10, %v219_v12 }
  0x47   : > { %v223_v18 = vadd.f32 %v222_v13, %v221_v15  ;;  %v249_v33 = vstv (!%p342_p7), %s248_s6 }
  0x49   : > { %v225_v20 = vadd.f32 %v224_v16, %v223_v18 }
  0x4b   : > { %v227_v22 = vadd.f32 %v226_v19, %v225_v20  ;;  %235 = sbr.rel (%p342_p7) target bundleno = 239 (0xef), region = 44 }
  0x4d   : > { %v229_v24 = vadd.f32 %v228_v21, %v227_v22 }
  0x4f   : > { %v230_v25 = vadd.f32 %v229_v24, %v205_v23 }
  0x51   : > { %231 = vst.msk [vmem:[#allocation2] sm:$0xff] %vm214_vm1, %v230_v25 }
  0x58   : > { %v236_v26 = vld [vmem:[#allocation2] sm:$0xff] }
  0x59   : > { %v244_v28 = vmul.f32 %v343_v27, %v236_v26 }
  0x5b   : > { %v245_v29 = vsel %vm214_vm1, %v244_v28, 0.0 }
  0x5c   : > { %246 = vadd.xlane.f32.xlu0 %v245_v29 }
  0xe9   : > { %v247_v35 = vpop.xlane.xlu0 %246 }
  0xea   : > { %v250_v36 = vadd.f32 %v249_v33, %v247_v35 }
  0xec   : > { %v257_v37 = vrot.slane %v250_v36, %v256_v34 }
  0xee   : > { %260 = vst.msk [vmem:[#allocation7] sm:$0x1] %vm259_vm2, %v257_v37 }
  0xef PF: > { %p674_p9 = scmp.eq.s32.totalorder %s333_s2, 1  ;;  %s530_s7 = smov [#allocation7]  }
  0xf0   : > { %s270_s8 = sshll.u32 %s530_s7, 4  ;;  %s271_s8 = int_to_ptr.vmem [resolvable:$true] %s270_s8 }
  0xf1   : > { %s444_s10 = scalar_lea.vmem %s271_s8, 16  ;;  %s450_s11 = scalar_lea.vmem %s271_s8, 32 }
  0xf2   : > { %p445_p5 = scmp.ne.s32.totalorder %s271_s8, %s444_s10  ;;  %p451_p10 = scmp.lt.s32.totalorder %s271_s8, %s271_s8 }
  0xf3   : > { %p452_p12 = scmp.lt.s32.totalorder %s450_s11, %s444_s10 }
  0xf4   : > { %p446_p6 = pnand %p445_p5, %p674_p9 }
  0xf5   : > { %p453_p0 = por %p452_p12, %p451_p10 }
  0xf6   : > { %p447_p8 = pneg %p446_p6 }
  0xf8   : > { %p454_p1 = pnand %p453_p0, %p447_p8 }
  0xfa   : > { %457 = shalt.err (!%p454_p1)
}
  0xfb   : > { %s458_s13 = scalar_lea.hbm %s721_s3, 16 }
  0xfc   : > { %p459_p2 = scmp.ne.s32.totalorder %s721_s3, %s458_s13  ;;  %p464_p3 = scmp.lt.u32.totalorder %s458_s13, %s721_s3 }
  0xfe   : > { %p460_p11 = pnand %p459_p2, %p674_p9 }
 0x100   : > { %p461_p13 = pneg %p460_p11 }
 0x102   : > { %p466_p4 = pnand %p464_p3, %p461_p13 }
 0x104   : > { %469 = shalt.err (!%p466_p4)
}
 0x105   : > { %352 = dma.vmem_to_hbm [thread:$0]  (%p674_p9), %s271_s8, 16, %s721_s3, [#allocation6]  }
 0x106   : > { %499 = dma.done.wait (%p674_p9), [#allocation6], 16  }
 0x107   : > { %501 = vsyncadd (%p674_p9), [#allocation6], 4294967280 }
 0x108 PF: > { %s18_s19 = sadd.s32 1, %s524_s19   ;;  %s726_s14 = smov %s508_s15 }
 0x109   : > { %p15_p7 = scmp.ge.s32.totalorder %s18_s19, 4   ;;  %s727_s15 = smov %s512_s16 }
 0x10a   : > { %s728_s16 = smov %s605_s25  ;;  %s729_s17 = smov %s520_s18 }
 0x10b   : > { %s730_s18 = smov %s732_s20  ;;  %17 = sbr.rel (!%p15_p7) target bundleno = 7 (0x7), region = 78 }
 0x112   :  { %283 = vsyncpa [#allocation5], 1 }
 0x113   :  { %285 = vsyncpa [#allocation5 + $0x1], 1 }
 0x114   :  { %286 = vsyncpa [#allocation6], 1 }
 0x115   :  { %288 = vsyncpa [#allocation6 + $0x1], 1 }

</bundles_post_ra>
